<compile_context>
chip_gen: v5e
topology: v5e:2x2
jax: 0.10.0
libtpu: 0.0.40
codegen_flags: <defaults>
</compile_context>

<pallas_src>
import functools

import jax
import jax.numpy as jnp
from jax.experimental import pallas as pl
from jax.experimental.pallas import tpu as pltpu

_LANES = 128
_SUBLANES = 8
_MAX_BLOCK_ROWS = 2048   # 2048 x 128 f32 = 1 MiB per input block
_NUM_SPLITS = 2          # outer parallel axis (2 TCs on v7x; harmless elsewhere)


def _feature_loss_kernel(x_ref, y_ref, out_ref, *, use_l1, block_rows,
                         n_rows, inner_steps):
    c = pl.program_id(0)   # core split (parallel)
    i = pl.program_id(1)   # reduction steps (arbitrary)

    # Output block stays resident across the inner axis -> use it as the
    # per-core accumulator (zero it on the first inner step).
    @pl.when(i == 0)
    def _():
        out_ref[...] = jnp.zeros_like(out_ref)

    # Stream inputs in original dtype; cast in-register (HBM-bound kernel,
    # f32 VALU work is free filler on all generations).
    d = x_ref[...].astype(jnp.float32) - y_ref[...].astype(jnp.float32)
    val = jnp.abs(d) if use_l1 else d * d

    # Mask rows past the end of the real slab (ragged last block, or phantom
    # blocks introduced by the 2-way split). Uses the *unclamped* global
    # block index; the index_map clamps so the DMA stays in bounds.
    blk = c * inner_steps + i
    row = blk * block_rows + jax.lax.broadcasted_iota(
        jnp.int32, (block_rows, _LANES), 0)
    val = jnp.where(row < n_rows, val, jnp.float32(0.0))

    # Per-lane accumulation: pure VPU vreg adds in the hot loop; the single
    # cross-lane reduce is deferred to the (tiny) wrapper epilogue.
    out_ref[0] += jnp.sum(val.reshape(-1, _SUBLANES, _LANES), axis=0)


def feature_loss(x, y, use_l1=True):
    """Equivalent of FeatureLoss(use_l1)(x, y): mean L1 or MSE over all elements."""
    assert x.shape == y.shape, "x and y must have the same shape"
    total_elems = x.size

    xf = jnp.ravel(x)
    yf = jnp.ravel(y)

    # Only pad when the element count is not already a multiple of one
    # (8,128) vreg; zero padding contributes 0 to both L1 and MSE sums.
    pad_unit = _SUBLANES * _LANES
    padded = ((total_elems + pad_unit - 1) // pad_unit) * pad_unit
    if padded != total_elems:
        xf = jnp.pad(xf, (0, padded - total_elems))
        yf = jnp.pad(yf, (0, padded - total_elems))

    rows = padded // _LANES                 # multiple of 8
    x2 = xf.reshape(rows, _LANES)
    y2 = yf.reshape(rows, _LANES)

    block_rows = min(_MAX_BLOCK_ROWS, rows)  # multiple of 8
    n_blocks = (rows + block_rows - 1) // block_rows
    inner_steps = (n_blocks + _NUM_SPLITS - 1) // _NUM_SPLITS

    def in_map(c, i):
        # Clamp so phantom blocks (odd n_blocks) stay in bounds; their
        # contribution is masked to zero inside the kernel.
        return (jnp.minimum(c * inner_steps + i, n_blocks - 1), 0)

    kernel = functools.partial(
        _feature_loss_kernel,
        use_l1=use_l1,
        block_rows=block_rows,
        n_rows=rows,
        inner_steps=inner_steps,
    )

    partials = pl.pallas_call(
        kernel,
        out_shape=jax.ShapeDtypeStruct((_NUM_SPLITS, _SUBLANES, _LANES),
                                       jnp.float32),
        grid_spec=pltpu.PrefetchScalarGridSpec(
            num_scalar_prefetch=0,
            grid=(_NUM_SPLITS, inner_steps),
            in_specs=[
                pl.BlockSpec((block_rows, _LANES), in_map),
                pl.BlockSpec((block_rows, _LANES), in_map),
            ],
            out_specs=pl.BlockSpec((1, _SUBLANES, _LANES),
                                   lambda c, i: (c, 0, 0)),
        ),
        compiler_params=pltpu.CompilerParams(
            dimension_semantics=("parallel", "arbitrary"),
        ),
    )(x2, y2)

    # Tiny epilogue: single cross-lane reduce of 2*8*128 partials + divide.
    return jnp.sum(partials) / total_elems


if __name__ == "__main__":
    key = jax.random.PRNGKey(0)
    kx, ky = jax.random.split(key)

    # Primary small NCHW feature-map test.
    x = jax.random.normal(kx, (2, 4, 16, 16), dtype=jnp.float32)
    y = jax.random.normal(ky, (2, 4, 16, 16), dtype=jnp.float32)

    l1 = jax.block_until_ready(feature_loss(x, y, use_l1=True))
    mse = jax.block_until_ready(feature_loss(x, y, use_l1=False))
    ref_l1 = jnp.mean(jnp.abs(x - y))
    ref_mse = jnp.mean((x - y) ** 2)
    assert jnp.allclose(l1, ref_l1, rtol=1e-5, atol=1e-6), (l1, ref_l1)
    assert jnp.allclose(mse, ref_mse, rtol=1e-5, atol=1e-6), (mse, ref_mse)

    # Ragged element count (exercises the zero-pad fallback path).
    xr = jax.random.normal(kx, (2, 3, 7, 5), dtype=jnp.float32)
    yr = jax.random.normal(ky, (2, 3, 7, 5), dtype=jnp.float32)
    l1r = jax.block_until_ready(feature_loss(xr, yr, use_l1=True))
    assert jnp.allclose(l1r, jnp.mean(jnp.abs(xr - yr)), rtol=1e-5, atol=1e-6)

    # Multi-block + partial last block + phantom block from the 2-way split,
    # bf16 streamed in its original dtype (cast happens in-kernel).
    xb = jax.random.normal(kx, (2, 2308, 128), dtype=jnp.float32).astype(jnp.bfloat16)
    yb = jax.random.normal(ky, (2, 2308, 128), dtype=jnp.float32).astype(jnp.bfloat16)
    l1b = jax.block_until_ready(feature_loss(xb, yb, use_l1=True))
    refb = jnp.mean(jnp.abs(xb.astype(jnp.float32) - yb.astype(jnp.float32)))
    assert jnp.allclose(l1b, refb, rtol=1e-3, atol=1e-6), (l1b, refb)

    print("KERNEL_OK")
</pallas_src>

<mosaic_0001>
module attributes {stable_mosaic.version = 11 : i64} {
  func.func @_feature_loss_kernel(%arg0: i32, %arg1: i32, %arg2: memref<16x128xf32, #tpu.memory_space<vmem>>, %arg3: memref<16x128xf32, #tpu.memory_space<vmem>>, %arg4: memref<1x8x128xf32, #tpu.memory_space<vmem>>) attributes {dimension_semantics = [#tpu.dimension_semantics<parallel>, #tpu.dimension_semantics<arbitrary>], iteration_bounds = array<i64: 2, 1>, scalar_prefetch = 0 : i64, scratch_operands = 0 : i64, tpu.core_type = #tpu.core_type<tc>, window_params = [{transform_indices = @transform_0, window_bounds = array<i64: 16, 128>}, {transform_indices = @transform_1, window_bounds = array<i64: 16, 128>}, {transform_indices = @transform_2, window_bounds = array<i64: 1, 8, 128>}]} {
    %c0_i32 = arith.constant 0 : i32
    %0 = arith.cmpi eq, %arg1, %c0_i32 : i32
    %1 = arith.extui %0 : i1 to i32
    %c0_i32_0 = arith.constant 0 : i32
    %2 = arith.cmpi ne, %1, %c0_i32_0 : i32
    scf.if %2 {
      %cst_12 = arith.constant 0.000000e+00 : f32
      %25 = vector.broadcast %cst_12 : f32 to vector<1x8x128xf32>
      %c0_13 = arith.constant 0 : index
      %c0_14 = arith.constant 0 : index
      %c0_15 = arith.constant 0 : index
      %26 = vector.load %arg4[%c0_13, %c0_14, %c0_15] : memref<1x8x128xf32, #tpu.memory_space<vmem>>, vector<1x8x128xf32>
      tpu.vector_store %arg4[%c0_13, %c0_14, %c0_15], %25 {strides = array<i32>} : memref<1x8x128xf32, #tpu.memory_space<vmem>>, vector<1x8x128xf32>,
    } else {
    }
    %c0 = arith.constant 0 : index
    %c0_1 = arith.constant 0 : index
    %3 = vector.load %arg2[%c0, %c0_1] : memref<16x128xf32, #tpu.memory_space<vmem>>, vector<16x128xf32>
    %c0_2 = arith.constant 0 : index
    %c0_3 = arith.constant 0 : index
    %4 = vector.load %arg3[%c0_2, %c0_3] : memref<16x128xf32, #tpu.memory_space<vmem>>, vector<16x128xf32>
    %5 = arith.subf %3, %4 : vector<16x128xf32>
    %6 = math.absf %5 : vector<16x128xf32>
    %c1_i32 = arith.constant 1 : i32
    %7 = arith.muli %arg0, %c1_i32 : i32
    %8 = arith.addi %7, %arg1 : i32
    %c16_i32 = arith.constant 16 : i32
    %9 = arith.muli %8, %c16_i32 : i32
    %10 = tpu.iota {dimensions = array<i32: 0>} : vector<16x128xi32>
    %11 = vector.broadcast %9 : i32 to vector<16x128xi32>
    %12 = arith.addi %11, %10 : vector<16x128xi32>
    %c16_i32_4 = arith.constant 16 : i32
    %13 = vector.broadcast %c16_i32_4 : i32 to vector<16x128xi32>
    %14 = arith.cmpi slt, %12, %13 : vector<16x128xi32>
    %cst = arith.constant 0.000000e+00 : f32
    %15 = vector.broadcast %cst : f32 to vector<16x128xf32>
    %16 = arith.select %14, %6, %15 : vector<16x128xi1>, vector<16x128xf32>
    %c0_5 = arith.constant 0 : index
    %c0_6 = arith.constant 0 : index
    %c0_7 = arith.constant 0 : index
    %17 = vector.load %arg4[%c0_5, %c0_6, %c0_7] : memref<1x8x128xf32, #tpu.memory_space<vmem>>, vector<1x8x128xf32>
    %18 = vector.shape_cast %17 : vector<1x8x128xf32> to vector<8x128xf32>
    %19 = vector.shape_cast %16 : vector<16x128xf32> to vector<2x8x128xf32>
    %cst_8 = arith.constant dense<0.000000e+00> : vector<8x128xf32>
    %20 = vector.multi_reduction <add>, %19, %cst_8 [0] : vector<2x8x128xf32> to vector<8x128xf32>
    %21 = arith.addf %18, %20 : vector<8x128xf32>
    %c0_9 = arith.constant 0 : index
    %c0_10 = arith.constant 0 : index
    %c0_11 = arith.constant 0 : index
    %22 = vector.load %arg4[%c0_9, %c0_10, %c0_11] : memref<1x8x128xf32, #tpu.memory_space<vmem>>, vector<1x8x128xf32>
    %23 = vector.shape_cast %22 : vector<1x8x128xf32> to vector<8x128xf32>
    %24 = vector.shape_cast %21 : vector<8x128xf32> to vector<1x8x128xf32>
    tpu.vector_store %arg4[%c0_9, %c0_10, %c0_11], %24 {strides = array<i32>} : memref<1x8x128xf32, #tpu.memory_space<vmem>>, vector<1x8x128xf32>,
    return
  }
  func.func @transform_0(%arg0: i32, %arg1: i32) -> (i32, i32) {
    %c1_i32 = arith.constant 1 : i32
    %0 = arith.muli %arg0, %c1_i32 : i32
    %1 = arith.addi %0, %arg1 : i32
    %c0_i32 = arith.constant 0 : i32
    %2 = arith.minsi %1, %c0_i32 : i32
    %c0_i32_0 = arith.constant 0 : i32
    %c0_i32_1 = arith.constant 0 : i32
    return %2, %c0_i32_0 : i32, i32
  }
  func.func @transform_1(%arg0: i32, %arg1: i32) -> (i32, i32) {
    %c1_i32 = arith.constant 1 : i32
    %0 = arith.muli %arg0, %c1_i32 : i32
    %1 = arith.addi %0, %arg1 : i32
    %c0_i32 = arith.constant 0 : i32
    %2 = arith.minsi %1, %c0_i32 : i32
    %c0_i32_0 = arith.constant 0 : i32
    %c0_i32_1 = arith.constant 0 : i32
    return %2, %c0_i32_0 : i32, i32
  }
  func.func @transform_2(%arg0: i32, %arg1: i32) -> (i32, i32, i32) {
    %c0_i32 = arith.constant 0 : i32
    %c0_i32_0 = arith.constant 0 : i32
    %c0_i32_1 = arith.constant 0 : i32
    return %arg0, %c0_i32, %c0_i32_0 : i32, i32, i32
  }
}

</mosaic_0001>

<bundles_post_ra>
// kernel: tpu_custom_call.1
= control target key start
LH: loop header
LB: loop body
LE: loop exit
PB: predicated region body
PF: predicated region fallthrough
CT: control target
= control target key end

     0   :  { %7 = vsyncpa [#allocation3], 0  ;;  %s862_s0 = inlined_call_operand.hbm [shape: f32[16,128], index: 0, kind: input, shape index: {}]   ;;  %s863_s1 = inlined_call_operand.hbm [shape: f32[16,128], index: 1, kind: input, shape index: {}]   ;;  %s864_s2 = inlined_call_operand.hbm [shape: f32[2,8,128], index: 2, kind: output, shape index: {}]  }
   0x1   :  { %9 = vsyncpa [#allocation3 + $0x1], 0 }
   0x2   :  { %10 = vsyncpa [#allocation6], 0 }
   0x3   :  { %12 = vsyncpa [#allocation6 + $0x1], 0 }
   0x4   :  { %13 = vsyncpa [#allocation4], 0 }
   0x5   :  { %15 = vsyncpa [#allocation4 + $0x1], 0  ;;  %s693_s9 = smov 0   ;;  %s695_s10 = smov 0  }
   0x6   :  { %s697_s11 = smov 0   ;;  %s699_s12 = smov 0  }
   0x7   :  { %s701_s13 = smov 0   ;;  %s703_s14 = smov 0  }
   0x8   :  { %s705_s15 = smov 0   ;;  %s707_s16 = smov 0  }
   0x9 LB: > { %s390_s17 = sadd.s32 4294967295, %s672_s16   ;;  %s391_s18 = sadd.s32 4294967294, %s672_s16   ;;  %s672_s16 = sphi %s707_s16, %s21_s16   ;;  %s668_s15 = sphi %s705_s15, %s876_s15   ;;  %s664_s14 = sphi %s703_s14, %s875_s14   ;;  %s660_s13 = sphi %s701_s13, %s852_s13   ;;  %s656_s12 = sphi %s699_s12, %s874_s12   ;;  %s652_s11 = sphi %s697_s11, %s873_s11   ;;  %s648_s10 = sphi %s695_s10, %s872_s10   ;;  %s644_s9 = sphi %s693_s9, %s871_s9  }
   0xa   : > { %s33_s19 = sadd.s32 1, %s668_s15  ;;  %p641_p1 = scmp.ne.s32.totalorder %s660_s13, 0 }
   0xb   : > { %p35_p0 = scmp.ge.s32.totalorder %s33_s19, 2  ;;  %p54_p2 = scmp.eq.s32.totalorder %s672_s16, 0 }
   0xc   : > { %p59_p3 = scmp.ne.s32.totalorder %s660_s13, %s656_s12  ;;  %p60_p5 = scmp.eq.s32.totalorder %s390_s17, 0 }
   0xd   : > { %s878_s19 = smov (%p35_p0, %s33_s19), 0  ;;  %p739_p4 = por %p641_p1, %p54_p2 }
   0xe   : > { %p743_p6 = por %p60_p5, %p59_p3  ;;  %s101_s22 = ssub.s32 %s668_s15, %s878_s19 }
   0xf   : > { %p102_p7 = scmp.eq.s32.totalorder %s101_s22, 0  ;;  %s104_s23 = sadd.s32 1, %s652_s11 }
  0x10   : > { %p114_p8 = scmp.ne.s32.totalorder %s652_s11, %s648_s10  ;;  %p115_p9 = scmp.eq.s32.totalorder %s390_s17, 1 }
  0x11   : > { %s751_s24 = scalar_select %p102_p7, %s652_s11, %s104_s23  }
  0x12   : > { %p120_p10 = scmp.ne.s32.totalorder %s648_s10, %s644_s9  ;;  %p121_p11 = scmp.eq.s32.totalorder %s391_s18, 1 }
  0x13   : > { %p757_p12 = por %p115_p9, %p114_p8  ;;  %p393_p13 = scmp.ge.s32.totalorder %s672_s16, 2 }
  0x14   : > { %p762_p0 = por %p121_p11, %p120_p10  ;;  %p428_p1 = scmp.lt.s32.totalorder %s672_s16, 2 }
  0x15   : > { %s154_s29 = sshll.u32 %s862_s0, 4  ;;  %s674_s30 = smov [#allocation2]   ;;  %s155_s29 = int_to_ptr.hbm [resolvable:$true] %s154_s29 }
  0x16   : > { %s156_s3 = sshll.u32 %s674_s30, 4  ;;  %p772_p2 = pnand %p428_p1, %p739_p4  ;;  %s157_s3 = int_to_ptr.vmem [resolvable:$true] %s156_s3 }
  0x17   : > { %p400_p3 = scmp.ge.s32.totalorder %s672_s16, 1  ;;  %p189_p5 = scmp.lt.s32.totalorder %s672_s16, 3 }
  0x18   : > { %s505_s5 = sshra.s32 %s155_s29, 4  ;;  %p509_p8 = pneg %p772_p2  ;;  %s506_s5 = int_to_ptr.hbm [resolvable:$true] %s505_s5 }
  0x19   : > { %s507_s6 = scalar_lea.hbm %s506_s5, 16  ;;  %s512_s12 = scalar_lea.hbm %s862_s0, 16 }
  0x1a   : > { %p508_p7 = scmp.ne.s32.totalorder %s506_s5, %s507_s6  ;;  %p514_p4 = scmp.lt.s32.totalorder %s512_s12, %s507_s6 }
  0x1c   : > { %p510_p9 = pnand %p509_p8, %p508_p7 }
  0x1e   : > { %p511_p10 = pneg %p510_p9 }
  0x20   : > { %p516_p11 = pnand %p514_p4, %p511_p10 }
  0x22   : > { %519 = shalt.err (!%p516_p11)
}
  0x23   : > { %s675_s17 = smov 128   ;;  %s676_s18 = smov 8  }
  0x24   : > { %420 = dma.hbm_to_vmem [thread:$0]  (!%p772_p2), %s155_s29, 256, %s157_s3, [#allocation3], %s675_s17, %s675_s17, %s676_s18  }
  0x25   : > { %p792_p1 = pnand %p400_p3, %p189_p5  ;;  %s179_s27 = sshll.u32 %s863_s1, 4  ;;  %s180_s27 = int_to_ptr.hbm [resolvable:$true] %s179_s27 }
  0x26   : > { %s677_s28 = smov [#allocation5]   ;;  %s535_s5 = sshra.s32 %s180_s27, 4  ;;  %s536_s5 = int_to_ptr.hbm [resolvable:$true] %s535_s5 }
  0x27   : > { %s181_s30 = sshll.u32 %s677_s28, 4  ;;  %s537_s6 = scalar_lea.hbm %s536_s5, 16  ;;  %s182_s30 = int_to_ptr.vmem [resolvable:$true] %s181_s30 }
  0x28   : > { %p538_p7 = scmp.ne.s32.totalorder %s536_s5, %s537_s6  ;;  %s542_s7 = scalar_lea.hbm %s863_s1, 16 }
  0x29   : > { %p544_p3 = scmp.lt.s32.totalorder %s542_s7, %s537_s6 }
  0x2a   : > { %p540_p9 = pnand %p538_p7, %p509_p8 }
  0x2c   : > { %p541_p10 = pneg %p540_p9 }
  0x2e   : > { %p546_p5 = pnand %p544_p3, %p541_p10 }
  0x30   : > { %549 = shalt.err (!%p546_p5)
}
  0x31   : > { %423 = dma.hbm_to_vmem [thread:$0]  (!%p772_p2), %s180_s27, 256, %s182_s30, [#allocation6], %s675_s17, %s675_s17, %s676_s18  }
  0x32   : > { %193 = sbr.rel (%p792_p1) target bundleno = 75 (0x4b), region = 28  ;;  %s195_s8 = sand.u32 (!%p792_p1), 1, %s660_s13  }
  0x33   : > { %s401_s12 = sshll.u32 (!%p792_p1), %s195_s8, 4  ;;  %s196_s22 = scalar_lea.sflag (!%p792_p1), [#allocation3], %s195_s8 }
  0x34   : > { %s199_s23 = scalar_lea.vmem (!%p792_p1), [#allocation2], %s401_s12 }
  0x37   : > { %630 = dma.done.wait (%p743_p6), %s196_s22, 256  }
  0x38   : > { %632 = vsyncadd (%p743_p6), %s196_s22, 4294967040  ;;  %s206_s28 = scalar_lea.sflag [#allocation6], %s195_s8  ;;  %s209_s5 = scalar_lea.vmem [#allocation5], %s401_s12 }
  0x39   : > { %634 = dma.done.wait (%p743_p6), %s206_s28, 256  }
  0x3a   : > { %636 = vsyncadd (%p743_p6), %s206_s28, 4294967040  ;;  %s404_s4 = sshll.u32 %s664_s14, 4  ;;  %v259_v0 = vlaneseq  ;;  %s233_s17 = sand.u32 1, %s648_s10   ;;  %v249_v6 = vld [vmem:[%s199_s23] sm:$0xff]  ;;  %v250_v7 = vld [vmem:[%s199_s23 + $0x8] sm:$0xff] }
  0x3b   : > { %v262_v2 = vstv %s404_s4  ;;  %s403_s18 = sshll.u32 %s233_s17, 3  ;;  %v251_v8 = vld [vmem:[%s209_s5] sm:$0xff]  ;;  %s406_s20 = sshll.u32 %s664_s14, 3  ;;  %v252_v9 = vld [vmem:[%s209_s5 + $0x8] sm:$0xff] }
  0x3c   : > { %v260_v1 = vshrl.u32 %v259_v0, 7  ;;  %v253_v10 = vsub.f32 %v249_v6, %v251_v8  ;;  %v254_v11 = vsub.f32 %v250_v7, %v252_v9  ;;  %s284_s30 = scalar_lea.hbm %s864_s2, %s406_s20  ;;  %s235_s6 = scalar_lea.vmem [#allocation7], %s403_s18 }
  0x3d   : > { %s286_s29 = sshll.u32 %s235_s6, 4  ;;  %s288_s3 = sshll.u32 %s284_s30, 4  ;;  %s287_s29 = int_to_ptr.vmem [resolvable:$true] %s286_s29  ;;  %s289_s3 = int_to_ptr.hbm [resolvable:$true] %s288_s3 }
  0x3e   : > { %v261_v3 = vadd.s32 8, %v260_v1  ;;  %v263_v4 = vadd.s32 %v262_v2, %v260_v1  ;;  %v255_v12 = vand.u32 2147483647, %v253_v10  ;;  %v256_v13 = vand.u32 2147483647, %v254_v11  ;;  %s274_s14 = scalar_lea.sflag [#allocation4], %s233_s17 }
  0x3f   : > { %s579_s7 = sshra.s32 %s289_s3, 4  ;;  %s585_s23 = scalar_lea.hbm %s864_s2, 16  ;;  %s580_s7 = int_to_ptr.hbm [resolvable:$true] %s579_s7 }
  0x40   : > { %v264_v5 = vadd.s32 %v262_v2, %v261_v3  ;;  %vm265_vm0 = vcmp.lt.s32.totalorder %v263_v4, 16  ;;  %s581_s8 = scalar_lea.hbm %s580_s7, 8  ;;  %p586_p4 = scmp.lt.s32.totalorder %s580_s7, %s864_s2 }
  0x41   : > { %v267_v14 = vsel %vm265_vm0, %v255_v12, 0.0  ;;  %p582_p6 = scmp.ne.s32.totalorder %s580_s7, %s581_s8  ;;  %p587_p11 = scmp.lt.s32.totalorder %s585_s23, %s581_s8 }
  0x42   : > { %vm266_vm1 = vcmp.lt.s32.totalorder %v264_v5, 16 }
  0x43   : > { %v268_v15 = vsel %vm266_vm1, %v256_v13, 0.0  ;;  %p583_p2 = pnand %p582_p6, %p757_p12  ;;  %p588_p1 = por %p587_p11, %p586_p4 }
  0x44   : > { %v270_v16 = vadd.f32 %v268_v15, %v267_v14 }
  0x45   : > { %p584_p8 = pneg %p583_p2 }
  0x46   : > { %272 = vst [vmem:[%s235_s6] sm:$0xff] %v270_v16 }
  0x47   : > { %p589_p7 = pnand %p588_p1, %p584_p8 }
  0x49   : > { %592 = shalt.err (!%p589_p7)
}
  0x4a   : > { %415 = dma.vmem_to_hbm [thread:$0]  (%p757_p12), %s287_s29, 128, %s289_s3, %s274_s14  }
  0x4b PF: > { %s300_s4 = sand.u32 1, %s644_s9   ;;  %p425_p9 = pnand %p393_p13, %p762_p0 }
  0x4c   : > { %s301_s17 = scalar_lea.sflag [#allocation4], %s300_s4 }
  0x4d   : > { %p426_p10 = pneg %p425_p9 }
  0x4f   : > { %638 = dma.done.wait (%p426_p10), %s301_s17, 128  }
  0x50   : > { %640 = vsyncadd (%p426_p10), %s301_s17, 4294967168  ;;  %s21_s16 = sadd.s32 1, %s672_s16   ;;  %s871_s9 = smov %s648_s10 }
  0x51   : > { %p18_p3 = scmp.ge.s32.totalorder %s21_s16, 4   ;;  %s872_s10 = smov %s652_s11 }
  0x52   : > { %s873_s11 = smov %s751_s24  ;;  %s874_s12 = smov %s660_s13 }
  0x53   : > { %s852_s13 = smov 0   ;;  %s875_s14 = smov %s668_s15 }
  0x54   : > { %s876_s15 = smov %s878_s19  ;;  %20 = sbr.rel (!%p18_p3) target bundleno = 9 (0x9), region = 90 }
  0x59   :  { %307 = vsyncpa [#allocation3], 1 }
  0x5a   :  { %309 = vsyncpa [#allocation3 + $0x1], 1 }
  0x5b   :  { %310 = vsyncpa [#allocation6], 1 }
  0x5c   :  { %312 = vsyncpa [#allocation6 + $0x1], 1 }
  0x5d   :  { %313 = vsyncpa [#allocation4], 1 }
  0x5e   :  { %315 = vsyncpa [#allocation4 + $0x1], 1 }

</bundles_post_ra>
